<compile_context>
chip_gen: v7x
topology: tpu7x:2x2x1
jax: 0.10.0
libtpu: 0.0.40
codegen_flags: <defaults>
</compile_context>

<pallas_src>
import functools
from math import sqrt

import jax
import jax.numpy as jnp
from jax.experimental import pallas as pl
from jax.experimental.pallas import tpu as pltpu

_LANE = 128
_SUBLANE = 8


def _round_up(x, m):
    return ((x + m - 1) // m) * m


def _tpu_config():
    """Generation-specific (planning budget, scoped vmem limit, two-TC?) tuple."""
    kind = ""
    try:
        kind = jax.devices()[0].device_kind.lower()
    except Exception:
        pass
    two_tc = ("v7" in kind) or ("7x" in kind)

    vmem_phys = None
    try:
        vmem_phys = getattr(pltpu.get_tpu_info(), "vmem_capacity_bytes", None)
    except Exception:
        vmem_phys = None
    if vmem_phys is None:
        # v7x has 64 MiB / TC; v5e/v6e have 128 MiB. Unknown -> conservative.
        if two_tc:
            vmem_phys = 64 * 1024 * 1024
        elif kind:
            vmem_phys = 128 * 1024 * 1024
        else:
            vmem_phys = 64 * 1024 * 1024

    budget = int(vmem_phys * 0.70)   # bytes we plan tiles against
    limit = int(vmem_phys * 0.85)    # scoped-VMEM limit handed to Mosaic
    return budget, limit, two_tc


# --------------------------------------------------------------------------
# Kernels (x and w arrive as bf16; accumulation is f32 on the MXU)
# --------------------------------------------------------------------------
def _fullk_kernel(x_ref, w_ref, b_ref, o_ref):
    """Whole K resident in VMEM: one MXU matmul per (M, tn) output tile."""
    o_ref[...] = (
        jnp.dot(x_ref[...], w_ref[...], preferred_element_type=jnp.float32)
        + b_ref[...]
    ).astype(o_ref.dtype)


def _ktiled_kernel(x_ref, w_ref, b_ref, o_ref, acc_ref):
    """K is the last (reduction) grid axis; f32 accumulator carried in VMEM."""
    @pl.when(pl.program_id(1) == 0)
    def _():
        acc_ref[...] = jnp.zeros_like(acc_ref)

    acc_ref[...] += jnp.dot(x_ref[...], w_ref[...],
                            preferred_element_type=jnp.float32)

    @pl.when(pl.program_id(1) == pl.num_programs(1) - 1)
    def _():
        o_ref[...] = (acc_ref[...] + b_ref[...]).astype(o_ref.dtype)


# --------------------------------------------------------------------------
# pallas_call builders (traced inside the single jitted forward)
# --------------------------------------------------------------------------
def _call_fullk(x2d, w, b, *, tn, use_buffered, vmem_limit):
    M, K = x2d.shape
    _, Np = w.shape
    assert Np % tn == 0, (Np, tn)

    x_kwargs = {"pipeline_mode": pl.Buffered(1)} if use_buffered else {}
    cost = pl.CostEstimate(
        flops=2 * M * K * Np,
        transcendentals=0,
        bytes_accessed=M * K * 2 + K * Np * 2 + Np * 4 + M * Np * 4,
    )
    return pl.pallas_call(
        _fullk_kernel,
        out_shape=jax.ShapeDtypeStruct((M, Np), jnp.float32),
        grid_spec=pltpu.PrefetchScalarGridSpec(
            num_scalar_prefetch=0,
            grid=(Np // tn,),
            in_specs=[
                pl.BlockSpec((M, K), lambda j: (0, 0), **x_kwargs),   # resident x
                pl.BlockSpec((K, tn), lambda j: (0, j)),              # weight stream
                pl.BlockSpec((1, tn), lambda j: (0, j)),
            ],
            out_specs=pl.BlockSpec((M, tn), lambda j: (0, j)),
        ),
        compiler_params=pltpu.CompilerParams(
            dimension_semantics=("parallel",),
            vmem_limit_bytes=vmem_limit,
        ),
        cost_estimate=cost,
    )(x2d, w, b)


def _call_ktiled(x2d, w, b, *, tn, tk, use_buffered, vmem_limit):
    M, K = x2d.shape
    _, Np = w.shape
    assert Np % tn == 0 and K % tk == 0, (Np, tn, K, tk)

    w_kwargs = {"pipeline_mode": pl.Buffered(3)} if use_buffered else {}
    cost = pl.CostEstimate(
        flops=2 * M * K * Np,
        transcendentals=0,
        bytes_accessed=M * K * 2 + K * Np * 2 + Np * 4 + M * Np * 4,
    )
    return pl.pallas_call(
        _ktiled_kernel,
        out_shape=jax.ShapeDtypeStruct((M, Np), jnp.float32),
        grid_spec=pltpu.PrefetchScalarGridSpec(
            num_scalar_prefetch=0,
            grid=(Np // tn, K // tk),   # reduction (K) axis last
            in_specs=[
                pl.BlockSpec((M, tk), lambda j, k: (0, k)),
                pl.BlockSpec((tk, tn), lambda j, k: (k, j), **w_kwargs),
                pl.BlockSpec((1, tn), lambda j, k: (0, j)),
            ],
            out_specs=pl.BlockSpec((M, tn), lambda j, k: (0, j)),
            scratch_shapes=[pltpu.VMEM((M, tn), jnp.float32)],
        ),
        compiler_params=pltpu.CompilerParams(
            dimension_semantics=("parallel", "arbitrary"),
            vmem_limit_bytes=vmem_limit,
        ),
        cost_estimate=cost,
    )(x2d, w, b)


# --------------------------------------------------------------------------
# Single jitted forward: reshape + pad + cast + kernel + slice + reshape
# --------------------------------------------------------------------------
@functools.partial(
    jax.jit,
    static_argnames=("target_window", "tn", "tk", "use_ktiled", "use_buffered",
                     "vmem_limit"),
)
def _flatten_head_forward(x, w, b, *, target_window, tn, tk, use_ktiled,
                          use_buffered, vmem_limit):
    B, nv, d, p = x.shape
    nf = d * p
    M = B * nv
    Kp, _ = w.shape
    Mp = _round_up(M, _SUBLANE)

    # Flatten(start_dim=-2) + merge (B, n_vars): row-major reshape. Cast to bf16
    # here (not inside the kernel) so the streamed/resident x is half-width.
    x2d = x.reshape(M, nf).astype(jnp.bfloat16)
    if Mp != M or Kp != nf:
        x2d = jnp.pad(x2d, ((0, Mp - M), (0, Kp - nf)))   # zero pad: math no-op

    if use_ktiled:
        y2d = _call_ktiled(x2d, w, b, tn=tn, tk=tk,
                           use_buffered=use_buffered, vmem_limit=vmem_limit)
    else:
        y2d = _call_fullk(x2d, w, b, tn=tn,
                          use_buffered=use_buffered, vmem_limit=vmem_limit)

    return y2d[:M, :target_window].reshape(B, nv, target_window)


# --------------------------------------------------------------------------
# Module
# --------------------------------------------------------------------------
class FlattenHeadPallas:
    """JAX/Pallas re-implementation of TimeLLM.FlattenHead (eval mode)."""

    _buffered_ok = None   # class-level cache: does this Pallas accept pipeline_mode?

    def __init__(self, n_vars, nf, target_window, head_dropout=0, key=None):
        self.n_vars = n_vars
        self.nf = nf
        self.target_window = target_window
        # TODO(synk): nn.Dropout(head_dropout) is identity at inference; no kernel emitted.

        if key is None:
            key = jax.random.PRNGKey(0)
        kw, kb = jax.random.split(key)
        bound = 1.0 / sqrt(nf)
        w = jax.random.uniform(kw, (nf, target_window), jnp.float32, -bound, bound)
        b = jax.random.uniform(kb, (target_window,), jnp.float32, -bound, bound)
        # Keep f32 originals around for reference/parity checks.
        self.w_f32 = w
        self.b_f32 = b

        # Pad N to a lane multiple (unmasked lane-dense stores) and K to a lane
        # multiple (so K tiling never needs a per-call weight pad), once at init.
        self.n_pad = _round_up(target_window, _LANE)
        self.k_pad = _round_up(nf, _LANE)
        self.weight = (
            jnp.zeros((self.k_pad, self.n_pad), jnp.bfloat16)
            .at[:nf, :target_window].set(w.astype(jnp.bfloat16))
        )
        self.bias = (
            jnp.zeros((1, self.n_pad), jnp.float32)
            .at[0, :target_window].set(b)
        )

        budget, limit, two_tc = _tpu_config()
        self._budget = budget
        self._vmem_limit = limit
        self._two_tc = two_tc

    # ---------------- tile planning ----------------
    def _plan(self, M):
        Mp = _round_up(M, _SUBLANE)
        Kp, Np = self.k_pad, self.n_pad
        budget = self._budget

        tn_cands = [c for c in range(_LANE, Np + 1, _LANE) if Np % c == 0]

        def fullk_bytes(tn):
            # Plan conservatively with x double-buffered (covers the fallback
            # where pl.Buffered(1) is unavailable).
            return (2 * Mp * Kp * 2          # x bf16
                    + 2 * Kp * tn * 2        # weight bf16 stream
                    + 2 * tn * 4             # bias
                    + 2 * Mp * tn * 4)       # f32 output

        def ktiled_bytes(tn, tk):
            return (2 * Mp * tk * 2          # x bf16 stream
                    + 3 * tk * tn * 2        # weight bf16 stream (up to 3 buffers)
                    + 2 * tn * 4             # bias
                    + 2 * Mp * tn * 4        # f32 output
                    + Mp * tn * 4)           # f32 accumulator scratch

        def largest_fitting(cands):
            fit = [c for c in cands if fullk_bytes(c) <= budget]
            return max(fit) if fit else None

        tn = None
        # v7x (2 TCs): force an even >=2-way N split only when the weight stream
        # is large enough (>= 2 MiB) to amortize it; otherwise whole-N wins.
        if self._two_tc and Kp * Np * 2 >= (2 << 20) and Np >= 2 * _LANE:
            even = [c for c in tn_cands if c <= Np // 2 and (Np // c) % 2 == 0]
            tn = largest_fitting(even)
        if tn is None:
            tn = largest_fitting(tn_cands)   # 1-TC chips: whole N if it fits
        if tn is not None:
            return tn, 0, False              # full-K single-matmul path

        # K-tiled fallback (very large nf): reduction axis last, f32 accumulator.
        fit_tn = [c for c in tn_cands if ktiled_bytes(c, _LANE) <= budget]
        tn = max(fit_tn) if fit_tn else _LANE
        tk_cands = [c for c in range(_LANE, Kp + 1, _LANE) if Kp % c == 0]
        fit_tk = [c for c in tk_cands if ktiled_bytes(tn, c) <= budget]
        tk = max(fit_tk) if fit_tk else _LANE
        return tn, tk, True

    # ---------------- forward ----------------
    def __call__(self, x):
        B, nv, d, p = x.shape
        assert d * p == self.nf, f"expected nf={self.nf}, got {d * p}"
        M = B * nv
        tn, tk, use_ktiled = self._plan(M)

        use_buffered = FlattenHeadPallas._buffered_ok
        if use_buffered is None:
            if not hasattr(pl, "Buffered"):
                FlattenHeadPallas._buffered_ok = False
                use_buffered = False
            else:
                try:
                    y = _flatten_head_forward(
                        x, self.weight, self.bias,
                        target_window=self.target_window, tn=tn, tk=tk,
                        use_ktiled=use_ktiled, use_buffered=True,
                        vmem_limit=self._vmem_limit)
                    jax.block_until_ready(y)
                    FlattenHeadPallas._buffered_ok = True
                    return y
                except Exception:
                    FlattenHeadPallas._buffered_ok = False
                    use_buffered = False

        return _flatten_head_forward(
            x, self.weight, self.bias,
            target_window=self.target_window, tn=tn, tk=tk,
            use_ktiled=use_ktiled, use_buffered=use_buffered,
            vmem_limit=self._vmem_limit)


# --------------------------------------------------------------------------
# Demo / correctness check
# --------------------------------------------------------------------------
if __name__ == "__main__":
    # Small shapes consistent with TimeLLM's FlattenHead:
    #   B=2, n_vars=4, d_model=16, num_patches=8 -> nf = 128, target_window = 32
    B, n_vars, d_model, num_patches = 2, 4, 16, 8
    nf = d_model * num_patches
    target_window = 32

    key = jax.random.PRNGKey(0)
    kx, kp = jax.random.split(key)
    x = jax.random.normal(kx, (B, n_vars, d_model, num_patches), jnp.float32)

    head = FlattenHeadPallas(n_vars, nf, target_window, head_dropout=0, key=kp)

    y = head(x)
    y = jax.block_until_ready(y)

    # True f32 reference (same math as nn.Flatten + nn.Linear). The kernel uses
    # bf16 weight/activation streaming with f32 MXU accumulation => loose tol.
    x_flat = x.reshape(B, n_vars, nf)
    y_ref = x_flat @ head.w_f32 + head.b_f32

    assert y.shape == (B, n_vars, target_window)
    assert jnp.allclose(y, y_ref, atol=5e-2, rtol=5e-2), float(
        jnp.max(jnp.abs(y - y_ref))
    )

    print("KERNEL_OK")
</pallas_src>

<mosaic_0001>
module attributes {stable_mosaic.version = 11 : i64} {
  func.func @_fullk_kernel(%arg0: i32, %arg1: memref<8x128xbf16, #tpu.memory_space<vmem>>, %arg2: memref<128x128xbf16, #tpu.memory_space<vmem>>, %arg3: memref<1x128xf32, #tpu.memory_space<vmem>>, %arg4: memref<8x128xf32, #tpu.memory_space<vmem>>) attributes {dimension_semantics = [#tpu.dimension_semantics<parallel>], iteration_bounds = array<i64: 1>, scalar_prefetch = 0 : i64, scratch_operands = 0 : i64, tpu.core_type = #tpu.core_type<tc>, window_params = [{pipeline_mode = #tpu.pipeline_mode<synchronous>, transform_indices = @transform_0, window_bounds = array<i64: 8, 128>}, {transform_indices = @transform_1, window_bounds = array<i64: 128, 128>}, {transform_indices = @transform_2, window_bounds = array<i64: 1, 128>}, {transform_indices = @transform_3, window_bounds = array<i64: 8, 128>}]} {
    %c0 = arith.constant 0 : index
    %c0_0 = arith.constant 0 : index
    %0 = vector.load %arg1[%c0, %c0_0] : memref<8x128xbf16, #tpu.memory_space<vmem>>, vector<8x128xbf16>
    %c0_1 = arith.constant 0 : index
    %c0_2 = arith.constant 0 : index
    %1 = vector.load %arg2[%c0_1, %c0_2] : memref<128x128xbf16, #tpu.memory_space<vmem>>, vector<128x128xbf16>
    %cst = arith.constant dense<0.000000e+00> : vector<8x128xf32>
    %2 = tpu.matmul %0, %1, %cst {dimension_numbers = #tpu.dot_dimension_numbers<[1], [0], [0], [1], [0, 0, 1, 1], [], []>} : vector<8x128xbf16>, vector<128x128xbf16>, vector<8x128xf32> -> vector<8x128xf32>
    %c0_3 = arith.constant 0 : index
    %c0_4 = arith.constant 0 : index
    %3 = vector.load %arg3[%c0_3, %c0_4] : memref<1x128xf32, #tpu.memory_space<vmem>>, vector<1x128xf32>
    %4 = vector.broadcast %3 : vector<1x128xf32> to vector<8x128xf32>
    %5 = arith.addf %2, %4 : vector<8x128xf32>
    %c0_5 = arith.constant 0 : index
    %c0_6 = arith.constant 0 : index
    %6 = vector.load %arg4[%c0_5, %c0_6] : memref<8x128xf32, #tpu.memory_space<vmem>>, vector<8x128xf32>
    tpu.vector_store %arg4[%c0_5, %c0_6], %5 {strides = array<i32>} : memref<8x128xf32, #tpu.memory_space<vmem>>, vector<8x128xf32>,
    return
  }
  func.func @transform_0(%arg0: i32) -> (i32, i32) {
    %c0_i32 = arith.constant 0 : i32
    %c0_i32_0 = arith.constant 0 : i32
    %c0_i32_1 = arith.constant 0 : i32
    return %c0_i32, %c0_i32_0 : i32, i32
  }
  func.func @transform_1(%arg0: i32) -> (i32, i32) {
    %c0_i32 = arith.constant 0 : i32
    %c0_i32_0 = arith.constant 0 : i32
    return %c0_i32, %arg0 : i32, i32
  }
  func.func @transform_2(%arg0: i32) -> (i32, i32) {
    %c0_i32 = arith.constant 0 : i32
    %c0_i32_0 = arith.constant 0 : i32
    return %c0_i32, %arg0 : i32, i32
  }
  func.func @transform_3(%arg0: i32) -> (i32, i32) {
    %c0_i32 = arith.constant 0 : i32
    %c0_i32_0 = arith.constant 0 : i32
    return %c0_i32, %arg0 : i32, i32
  }
}

module attributes {stable_mosaic.version = 11 : i64} {
  func.func @_fullk_kernel(%arg0: i32, %arg1: memref<8x128xbf16, #tpu.memory_space<vmem>>, %arg2: memref<128x128xbf16, #tpu.memory_space<vmem>>, %arg3: memref<1x128xf32, #tpu.memory_space<vmem>>, %arg4: memref<8x128xf32, #tpu.memory_space<vmem>>) attributes {dimension_semantics = [#tpu.dimension_semantics<parallel>], iteration_bounds = array<i64: 1>, scalar_prefetch = 0 : i64, scratch_operands = 0 : i64, tpu.core_type = #tpu.core_type<tc>, window_params = [{pipeline_mode = #tpu.pipeline_mode<synchronous>, transform_indices = @transform_0, window_bounds = array<i64: 8, 128>}, {transform_indices = @transform_1, window_bounds = array<i64: 128, 128>}, {transform_indices = @transform_2, window_bounds = array<i64: 1, 128>}, {transform_indices = @transform_3, window_bounds = array<i64: 8, 128>}]} {
    %c0 = arith.constant 0 : index
    %c0_0 = arith.constant 0 : index
    %0 = vector.load %arg1[%c0, %c0_0] : memref<8x128xbf16, #tpu.memory_space<vmem>>, vector<8x128xbf16>
    %c0_1 = arith.constant 0 : index
    %c0_2 = arith.constant 0 : index
    %1 = vector.load %arg2[%c0_1, %c0_2] : memref<128x128xbf16, #tpu.memory_space<vmem>>, vector<128x128xbf16>
    %cst = arith.constant dense<0.000000e+00> : vector<8x128xf32>
    %2 = tpu.matmul %0, %1, %cst {dimension_numbers = #tpu.dot_dimension_numbers<[1], [0], [0], [1], [0, 0, 1, 1], [], []>} : vector<8x128xbf16>, vector<128x128xbf16>, vector<8x128xf32> -> vector<8x128xf32>
    %c0_3 = arith.constant 0 : index
    %c0_4 = arith.constant 0 : index
    %3 = vector.load %arg3[%c0_3, %c0_4] : memref<1x128xf32, #tpu.memory_space<vmem>>, vector<1x128xf32>
    %4 = vector.broadcast %3 : vector<1x128xf32> to vector<8x128xf32>
    %5 = arith.addf %2, %4 : vector<8x128xf32>
    %c0_5 = arith.constant 0 : index
    %c0_6 = arith.constant 0 : index
    %6 = vector.load %arg4[%c0_5, %c0_6] : memref<8x128xf32, #tpu.memory_space<vmem>>, vector<8x128xf32>
    tpu.vector_store %arg4[%c0_5, %c0_6], %5 {strides = array<i32>} : memref<8x128xf32, #tpu.memory_space<vmem>>, vector<8x128xf32>,
    return
  }
  func.func @transform_0(%arg0: i32) -> (i32, i32) {
    %c0_i32 = arith.constant 0 : i32
    %c0_i32_0 = arith.constant 0 : i32
    %c0_i32_1 = arith.constant 0 : i32
    return %c0_i32, %c0_i32_0 : i32, i32
  }
  func.func @transform_1(%arg0: i32) -> (i32, i32) {
    %c0_i32 = arith.constant 0 : i32
    %c0_i32_0 = arith.constant 0 : i32
    return %c0_i32, %arg0 : i32, i32
  }
  func.func @transform_2(%arg0: i32) -> (i32, i32) {
    %c0_i32 = arith.constant 0 : i32
    %c0_i32_0 = arith.constant 0 : i32
    return %c0_i32, %arg0 : i32, i32
  }
  func.func @transform_3(%arg0: i32) -> (i32, i32) {
    %c0_i32 = arith.constant 0 : i32
    %c0_i32_0 = arith.constant 0 : i32
    return %c0_i32, %arg0 : i32, i32
  }
}

</mosaic_0001>

<bundles_post_ra>
// kernel: _flatten_head_forward.1
= control target key start
LH: loop header
LB: loop body
LE: loop exit
PB: predicated region body
PF: predicated region fallthrough
CT: control target
= control target key end

     0   :  { %8 = vsyncpa [#allocation3], 0  ;;  %s406_s0 = inlined_call_operand.hbm [shape: bf16[8,128], index: 0, kind: input, shape index: {}]   ;;  %s407_s1 = inlined_call_operand.hbm [shape: bf16[128,128], index: 1, kind: input, shape index: {}]   ;;  %s408_s2 = inlined_call_operand.hbm [shape: f32[1,128], index: 2, kind: input, shape index: {}]   ;;  %s409_s3 = inlined_call_operand.hbm [shape: f32[8,128], index: 3, kind: output, shape index: {}]  }
   0x1   :  { %9 = vsyncpa [#allocation6], 0 }
   0x2   :  { %10 = vsyncpa [#allocation4], 0  ;;  %s330_s12 = smov [#allocation5]   ;;  %s236_s16 = scalar_lea.hbm %s407_s1, 1024 }
   0x3   :  { %s26_s13 = sshll.u32 %s330_s12, 4  ;;  %p237_p0 = scmp.ne.s32.totalorder %s407_s1, %s236_s16  ;;  %s27_s13 = int_to_ptr.vmem [resolvable:$true] %s26_s13 }
   0x4   :  { %p240_p1 = scmp.lt.u32.totalorder %s236_s16, %s407_s1 }
   0x6   :  { %p242_p2 = pnand %p240_p1, %p237_p0 }
   0x8   :  { %245 = shalt.err (!%p242_p2)
}
   0x9   :  { %s246_s21 = scalar_lea.vmem %s27_s13, 1024  ;;  %p251_p4 = scmp.lt.s32.totalorder %s27_s13, %s27_s13 }
   0xa   :  { %p247_p3 = scmp.ne.s32.totalorder %s27_s13, %s246_s21  ;;  %p252_p5 = scmp.lt.s32.totalorder %s246_s21, %s246_s21 }
   0xc   :  { %p253_p6 = por %p252_p5, %p251_p4 }
   0xe   :  { %p254_p7 = pnand %p253_p6, %p247_p3 }
  0x10   :  { %257 = shalt.err (!%p254_p7)
}
  0x11   :  { %s331_s22 = smov 64   ;;  %s332_s23 = smov 4  }
  0x12   :  { %32 = dma.hbm_to_vmem [thread:$0]  %s407_s1, 1024, %s27_s13, [#allocation6], %s331_s22, %s331_s22, %s332_s23  }
  0x13   :  { %s333_s26 = smov [#allocation2]   ;;  %s334_s28 = smov [#allocation7]  }
  0x14   :  { %s17_s27 = sshll.u32 %s333_s26, 4  ;;  %s39_s29 = sshll.u32 %s334_s28, 4  ;;  %s18_s27 = int_to_ptr.vmem [resolvable:$true] %s17_s27  ;;  %s40_s29 = int_to_ptr.vmem [resolvable:$true] %s39_s29 }
  0x15   :  { %s258_s5 = scalar_lea.hbm %s406_s0, 64 }
  0x16   :  { %p259_p8 = scmp.ne.s32.totalorder %s406_s0, %s258_s5  ;;  %p262_p9 = scmp.lt.u32.totalorder %s258_s5, %s406_s0 }
  0x18   :  { %p264_p10 = pnand %p262_p9, %p259_p8 }
  0x1a   :  { %267 = shalt.err (!%p264_p10)
}
  0x1b   :  { %s268_s1 = scalar_lea.vmem %s18_s27, 64  ;;  %p273_p12 = scmp.lt.s32.totalorder %s18_s27, %s18_s27 }
  0x1c   :  { %p269_p11 = scmp.ne.s32.totalorder %s18_s27, %s268_s1  ;;  %p274_p13 = scmp.lt.s32.totalorder %s268_s1, %s268_s1 }
  0x1e   :  { %p275_p0 = por %p274_p13, %p273_p12 }
  0x20   :  { %p276_p1 = pnand %p275_p0, %p269_p11 }
  0x22   :  { %279 = shalt.err (!%p276_p1)
}
  0x23   :  { %20 = dma.hbm_to_vmem [thread:$0]  %s406_s0, 64, %s18_s27, [#allocation3]  }
  0x24   :  { %s280_s14 = scalar_lea.hbm %s408_s2, 16 }
  0x25   :  { %p281_p2 = scmp.ne.s32.totalorder %s408_s2, %s280_s14  ;;  %p284_p3 = scmp.lt.u32.totalorder %s280_s14, %s408_s2 }
  0x27   :  { %p286_p4 = pnand %p284_p3, %p281_p2 }
  0x29   :  { %289 = shalt.err (!%p286_p4)
}
  0x2a   :  { %s290_s19 = scalar_lea.vmem %s40_s29, 16  ;;  %s294_s20 = scalar_lea.vmem %s40_s29, 32 }
  0x2b   :  { %p291_p5 = scmp.ne.s32.totalorder %s40_s29, %s290_s19  ;;  %p295_p6 = scmp.lt.s32.totalorder %s40_s29, %s40_s29 }
  0x2c   :  { %p296_p7 = scmp.lt.s32.totalorder %s294_s20, %s290_s19 }
  0x2e   :  { %p297_p8 = por %p296_p7, %p295_p6 }
  0x30   :  { %p298_p9 = pnand %p297_p8, %p291_p5 }
  0x32   :  { %301 = shalt.err (!%p298_p9)
}
  0x33   :  { %42 = dma.hbm_to_vmem [thread:$0]  %s408_s2, 16, %s40_s29, [#allocation6]  }
  0x34   :  { %324 = dma.done.wait [#allocation3], 64  }
  0x35   :  { %325 = vsyncadd [#allocation3], 4294967232 }
  0x36   :  { %326 = dma.done.wait [#allocation6], 1040  }
  0x37   :  { %327 = vsyncadd [#allocation6], 4294966256  ;;  %v335_v0 = vmov 0.0   ;;  %vm336_vm0 = vmmov 0   ;;  %v228_v1 = vld [vmem:[#allocation5] sm:$0xff]   ;;  %v229_v2 = vld [vmem:[#allocation5 + $0x8] sm:$0xff]  }
  0x38   :  { %200 = vmatprep.subr.bf16.mxu0 %v335_v0  ;;  %216 = vmatprep.mubr.msk.bf16.mxu0 %vm336_vm0, %v335_v0  ;;  %v230_v3 = vld [vmem:[#allocation5 + $0x10] sm:$0xff]   ;;  %v231_v4 = vld [vmem:[#allocation5 + $0x18] sm:$0xff]   ;;  %v232_v5 = vld [vmem:[#allocation5 + $0x20] sm:$0xff]   ;;  %s337_s2 = smov [#allocation8]  }
  0x39   :  { %201 = vmatpush3.bf16.msra.mxu0 %v228_v1  ;;  %v233_v6 = vld [vmem:[#allocation5 + $0x28] sm:$0xff]   ;;  %v234_v7 = vld [vmem:[#allocation5 + $0x30] sm:$0xff]   ;;  %v235_v8 = vld [vmem:[#allocation5 + $0x38] sm:$0xff]   ;;  %s172_s22 = sshll.u32 %s337_s2, 4  ;;  %s173_s22 = int_to_ptr.vmem [resolvable:$true] %s172_s22 }
  0x3a   :  { %202 = vmatprep.subr.bf16.mxu0 %v335_v0  ;;  %v53_v9 = vld [vmem:[#allocation2] sm:$0xf]  ;;  %v182_v10 = vld [vmem:[#allocation7] ss:$0 sm:$0xff]  ;;  %s302_s23 = scalar_lea.vmem %s173_s22, 128  ;;  %p307_p11 = scmp.lt.s32.totalorder %s173_s22, %s173_s22 }
  0x3b   :  { %p303_p10 = scmp.ne.s32.totalorder %s173_s22, %s302_s23  ;;  %p308_p12 = scmp.lt.s32.totalorder %s302_s23, %s302_s23 }
  0x3d   :  { %203 = vmatpush3.bf16.msra.mxu0 %v229_v2  ;;  %p309_p13 = por %p308_p12, %p307_p11 }
  0x3e   :  { %204 = vmatprep.subr.bf16.mxu0 %v335_v0 }
  0x3f   :  { %p310_p0 = pnand %p309_p13, %p303_p10 }
  0x41   :  { %205 = vmatpush3.bf16.msra.mxu0 %v230_v3 }
  0x42   :  { %206 = vmatprep.subr.bf16.mxu0 %v335_v0 }
  0x45   :  { %207 = vmatpush3.bf16.msra.mxu0 %v231_v4 }
  0x46   :  { %208 = vmatprep.subr.bf16.mxu0 %v335_v0 }
  0x49   :  { %209 = vmatpush3.bf16.msra.mxu0 %v232_v5 }
  0x4a   :  { %210 = vmatprep.subr.bf16.mxu0 %v335_v0 }
  0x4d   :  { %211 = vmatpush3.bf16.msra.mxu0 %v233_v6 }
  0x4e   :  { %212 = vmatprep.subr.bf16.mxu0 %v335_v0 }
  0x51   :  { %213 = vmatpush3.bf16.msra.mxu0 %v234_v7 }
  0x52   :  { %214 = vmatprep.subr.bf16.mxu0 %v335_v0 }
  0x55   :  { %215 = vmatpush3.bf16.msra.mxu0 %v235_v8 }
  0x58   :  { %217 = vmatmul.mubr.bf16.vlgmr.msra.gmra.mrb[0].mxu0 %v53_v9 }
 0x12b   :  { %v159_v11 = vpop.f32.mrb[0].mxu0 }
 0x12c   :  { %v160_v12 = vadd.f32 %v182_v10, %v159_v11  ;;  %v218_v13 = vpop.f32.mrb[1].mxu0 }
 0x12d   :  { %v162_v14 = vpop.f32.mrb[2].mxu0 }
 0x12e   :  { %165 = vst [vmem:[#allocation8] sm:$0xff] %v160_v12  ;;  %v219_v15 = vpop.f32.mrb[3].mxu0 }
 0x12f   :  { %313 = shalt.err (!%p310_p0)
}
 0x130   :  { %s314_s26 = scalar_lea.hbm %s409_s3, 128 }
 0x131   :  { %p315_p1 = scmp.ne.s32.totalorder %s409_s3, %s314_s26  ;;  %p318_p2 = scmp.lt.u32.totalorder %s314_s26, %s409_s3 }
 0x133   :  { %p320_p3 = pnand %p318_p2, %p315_p1 }
 0x135   :  { %323 = shalt.err (!%p320_p3)
}
 0x136   :  { %175 = dma.vmem_to_hbm [thread:$0]  %s173_s22, 128, %s409_s3, [#allocation4]  }
 0x137   :  { %328 = dma.done.wait [#allocation4], 128  }
 0x138   :  { %329 = vsyncadd [#allocation4], 4294967168 }
 0x139   :  { %179 = vsyncpa [#allocation3], 1 }
 0x13a   :  { %180 = vsyncpa [#allocation6], 1 }
 0x13b   :  { %181 = vsyncpa [#allocation4], 1 }

// kernel: _flatten_head_forward.1
= control target key start
LH: loop header
LB: loop body
LE: loop exit
PB: predicated region body
PF: predicated region fallthrough
CT: control target
= control target key end

     0   :  { %8 = vsyncpa [#allocation3], 0  ;;  %s406_s0 = inlined_call_operand.hbm [shape: bf16[8,128], index: 0, kind: input, shape index: {}]   ;;  %s407_s1 = inlined_call_operand.hbm [shape: bf16[128,128], index: 1, kind: input, shape index: {}]   ;;  %s408_s2 = inlined_call_operand.hbm [shape: f32[1,128], index: 2, kind: input, shape index: {}]   ;;  %s409_s3 = inlined_call_operand.hbm [shape: f32[8,128], index: 3, kind: output, shape index: {}]  }
   0x1   :  { %9 = vsyncpa [#allocation6], 0 }
   0x2   :  { %10 = vsyncpa [#allocation4], 0  ;;  %s330_s12 = smov [#allocation5]   ;;  %s236_s16 = scalar_lea.hbm %s407_s1, 1024 }
   0x3   :  { %s26_s13 = sshll.u32 %s330_s12, 4  ;;  %p237_p0 = scmp.ne.s32.totalorder %s407_s1, %s236_s16  ;;  %s27_s13 = int_to_ptr.vmem [resolvable:$true] %s26_s13 }
   0x4   :  { %p240_p1 = scmp.lt.u32.totalorder %s236_s16, %s407_s1 }
   0x6   :  { %p242_p2 = pnand %p240_p1, %p237_p0 }
   0x8   :  { %245 = shalt.err (!%p242_p2)
}
   0x9   :  { %s246_s21 = scalar_lea.vmem %s27_s13, 1024  ;;  %p251_p4 = scmp.lt.s32.totalorder %s27_s13, %s27_s13 }
   0xa   :  { %p247_p3 = scmp.ne.s32.totalorder %s27_s13, %s246_s21  ;;  %p252_p5 = scmp.lt.s32.totalorder %s246_s21, %s246_s21 }
   0xc   :  { %p253_p6 = por %p252_p5, %p251_p4 }
   0xe   :  { %p254_p7 = pnand %p253_p6, %p247_p3 }
  0x10   :  { %257 = shalt.err (!%p254_p7)
}
  0x11   :  { %s331_s22 = smov 64   ;;  %s332_s23 = smov 4  }
  0x12   :  { %32 = dma.hbm_to_vmem [thread:$0]  %s407_s1, 1024, %s27_s13, [#allocation6], %s331_s22, %s331_s22, %s332_s23  }
  0x13   :  { %s333_s26 = smov [#allocation2]   ;;  %s334_s28 = smov [#allocation7]  }
  0x14   :  { %s17_s27 = sshll.u32 %s333_s26, 4  ;;  %s39_s29 = sshll.u32 %s334_s28, 4  ;;  %s18_s27 = int_to_ptr.vmem [resolvable:$true] %s17_s27  ;;  %s40_s29 = int_to_ptr.vmem [resolvable:$true] %s39_s29 }
  0x15   :  { %s258_s5 = scalar_lea.hbm %s406_s0, 64 }
  0x16   :  { %p259_p8 = scmp.ne.s32.totalorder %s406_s0, %s258_s5  ;;  %p262_p9 = scmp.lt.u32.totalorder %s258_s5, %s406_s0 }
  0x18   :  { %p264_p10 = pnand %p262_p9, %p259_p8 }
  0x1a   :  { %267 = shalt.err (!%p264_p10)
}
  0x1b   :  { %s268_s1 = scalar_lea.vmem %s18_s27, 64  ;;  %p273_p12 = scmp.lt.s32.totalorder %s18_s27, %s18_s27 }
  0x1c   :  { %p269_p11 = scmp.ne.s32.totalorder %s18_s27, %s268_s1  ;;  %p274_p13 = scmp.lt.s32.totalorder %s268_s1, %s268_s1 }
  0x1e   :  { %p275_p0 = por %p274_p13, %p273_p12 }
  0x20   :  { %p276_p1 = pnand %p275_p0, %p269_p11 }
  0x22   :  { %279 = shalt.err (!%p276_p1)
}
  0x23   :  { %20 = dma.hbm_to_vmem [thread:$0]  %s406_s0, 64, %s18_s27, [#allocation3]  }
  0x24   :  { %s280_s14 = scalar_lea.hbm %s408_s2, 16 }
  0x25   :  { %p281_p2 = scmp.ne.s32.totalorder %s408_s2, %s280_s14  ;;  %p284_p3 = scmp.lt.u32.totalorder %s280_s14, %s408_s2 }
  0x27   :  { %p286_p4 = pnand %p284_p3, %p281_p2 }
  0x29   :  { %289 = shalt.err (!%p286_p4)
}
  0x2a   :  { %s290_s19 = scalar_lea.vmem %s40_s29, 16  ;;  %s294_s20 = scalar_lea.vmem %s40_s29, 32 }
  0x2b   :  { %p291_p5 = scmp.ne.s32.totalorder %s40_s29, %s290_s19  ;;  %p295_p6 = scmp.lt.s32.totalorder %s40_s29, %s40_s29 }
  0x2c   :  { %p296_p7 = scmp.lt.s32.totalorder %s294_s20, %s290_s19 }
  0x2e   :  { %p297_p8 = por %p296_p7, %p295_p6 }
  0x30   :  { %p298_p9 = pnand %p297_p8, %p291_p5 }
  0x32   :  { %301 = shalt.err (!%p298_p9)
}
  0x33   :  { %42 = dma.hbm_to_vmem [thread:$0]  %s408_s2, 16, %s40_s29, [#allocation6]  }
  0x34   :  { %324 = dma.done.wait [#allocation3], 64  }
  0x35   :  { %325 = vsyncadd [#allocation3], 4294967232 }
  0x36   :  { %326 = dma.done.wait [#allocation6], 1040  }
  0x37   :  { %327 = vsyncadd [#allocation6], 4294966256  ;;  %v335_v0 = vmov 0.0   ;;  %vm336_vm0 = vmmov 0   ;;  %v228_v1 = vld [vmem:[#allocation5] sm:$0xff]   ;;  %v229_v2 = vld [vmem:[#allocation5 + $0x8] sm:$0xff]  }
  0x38   :  { %200 = vmatprep.subr.bf16.mxu0 %v335_v0  ;;  %216 = vmatprep.mubr.msk.bf16.mxu0 %vm336_vm0, %v335_v0  ;;  %v230_v3 = vld [vmem:[#allocation5 + $0x10] sm:$0xff]   ;;  %v231_v4 = vld [vmem:[#allocation5 + $0x18] sm:$0xff]   ;;  %v232_v5 = vld [vmem:[#allocation5 + $0x20] sm:$0xff]   ;;  %s337_s2 = smov [#allocation8]  }
  0x39   :  { %201 = vmatpush3.bf16.msra.mxu0 %v228_v1  ;;  %v233_v6 = vld [vmem:[#allocation5 + $0x28] sm:$0xff]   ;;  %v234_v7 = vld [vmem:[#allocation5 + $0x30] sm:$0xff]   ;;  %v235_v8 = vld [vmem:[#allocation5 + $0x38] sm:$0xff]   ;;  %s172_s22 = sshll.u32 %s337_s2, 4  ;;  %s173_s22 = int_to_ptr.vmem [resolvable:$true] %s172_s22 }
  0x3a   :  { %202 = vmatprep.subr.bf16.mxu0 %v335_v0  ;;  %v53_v9 = vld [vmem:[#allocation2] sm:$0xf]  ;;  %v182_v10 = vld [vmem:[#allocation7] ss:$0 sm:$0xff]  ;;  %s302_s23 = scalar_lea.vmem %s173_s22, 128  ;;  %p307_p11 = scmp.lt.s32.totalorder %s173_s22, %s173_s22 }
  0x3b   :  { %p303_p10 = scmp.ne.s32.totalorder %s173_s22, %s302_s23  ;;  %p308_p12 = scmp.lt.s32.totalorder %s302_s23, %s302_s23 }
  0x3d   :  { %203 = vmatpush3.bf16.msra.mxu0 %v229_v2  ;;  %p309_p13 = por %p308_p12, %p307_p11 }
  0x3e   :  { %204 = vmatprep.subr.bf16.mxu0 %v335_v0 }
  0x3f   :  { %p310_p0 = pnand %p309_p13, %p303_p10 }
  0x41   :  { %205 = vmatpush3.bf16.msra.mxu0 %v230_v3 }
  0x42   :  { %206 = vmatprep.subr.bf16.mxu0 %v335_v0 }
  0x45   :  { %207 = vmatpush3.bf16.msra.mxu0 %v231_v4 }
  0x46   :  { %208 = vmatprep.subr.bf16.mxu0 %v335_v0 }
  0x49   :  { %209 = vmatpush3.bf16.msra.mxu0 %v232_v5 }
  0x4a   :  { %210 = vmatprep.subr.bf16.mxu0 %v335_v0 }
  0x4d   :  { %211 = vmatpush3.bf16.msra.mxu0 %v233_v6 }
  0x4e   :  { %212 = vmatprep.subr.bf16.mxu0 %v335_v0 }
  0x51   :  { %213 = vmatpush3.bf16.msra.mxu0 %v234_v7 }
  0x52   :  { %214 = vmatprep.subr.bf16.mxu0 %v335_v0 }
  0x55   :  { %215 = vmatpush3.bf16.msra.mxu0 %v235_v8 }
  0x58   :  { %217 = vmatmul.mubr.bf16.vlgmr.msra.gmra.mrb[0].mxu0 %v53_v9 }
 0x12b   :  { %v159_v11 = vpop.f32.mrb[0].mxu0 }
 0x12c   :  { %v160_v12 = vadd.f32 %v182_v10, %v159_v11  ;;  %v218_v13 = vpop.f32.mrb[1].mxu0 }
 0x12d   :  { %v162_v14 = vpop.f32.mrb[2].mxu0 }
 0x12e   :  { %165 = vst [vmem:[#allocation8] sm:$0xff] %v160_v12  ;;  %v219_v15 = vpop.f32.mrb[3].mxu0 }
 0x12f   :  { %313 = shalt.err (!%p310_p0)
}
 0x130   :  { %s314_s26 = scalar_lea.hbm %s409_s3, 128 }
 0x131   :  { %p315_p1 = scmp.ne.s32.totalorder %s409_s3, %s314_s26  ;;  %p318_p2 = scmp.lt.u32.totalorder %s314_s26, %s409_s3 }
 0x133   :  { %p320_p3 = pnand %p318_p2, %p315_p1 }
 0x135   :  { %323 = shalt.err (!%p320_p3)
}
 0x136   :  { %175 = dma.vmem_to_hbm [thread:$0]  %s173_s22, 128, %s409_s3, [#allocation4]  }
 0x137   :  { %328 = dma.done.wait [#allocation4], 128  }
 0x138   :  { %329 = vsyncadd [#allocation4], 4294967168 }
 0x139   :  { %179 = vsyncpa [#allocation3], 1 }
 0x13a   :  { %180 = vsyncpa [#allocation6], 1 }
 0x13b   :  { %181 = vsyncpa [#allocation4], 1 }

</bundles_post_ra>
